<compile_context>
chip_gen: v7x
topology: tpu7x:2x2x1
jax: 0.10.0
libtpu: 0.0.40
codegen_flags: <defaults>
</compile_context>

<pallas_src>
import jax
import jax.numpy as jnp
import numpy as np
from jax.experimental import pallas as pl
from jax.experimental.pallas import tpu as pltpu

NEG_SLOPE = 0.01  # torch.nn.LeakyReLU default
LANES = 128       # lane width; batch is laid out as (rows, LANES)


def _leaky_relu(x):
    # max(x, a*x) == LeakyReLU(x) for 0 < a < 1; 2 VPU ops vs 3 for where().
    return jnp.maximum(x, NEG_SLOPE * x)


def _round_up(a, b):
    return ((a + b - 1) // b) * b


def _affine_rows(wb_ref, rows, *, act):
    """y[f] = sum_i wb[f, i] * rows[i] + wb[f, n_in]  (weights/bias read from SMEM).

    `rows` is a list of (R, LANES) f32 slabs: features on the Python-list axis,
    batch dense on sublanes+lanes.  Fully unrolled — feature dims here are only 2-4.
    """
    n_out, n_in_p1 = wb_ref.shape
    n_in = n_in_p1 - 1
    outs = []
    for f in range(n_out):
        acc = rows[0] * wb_ref[f, 0]
        for i in range(1, n_in):
            acc = acc + rows[i] * wb_ref[f, i]
        acc = acc + wb_ref[f, n_in]          # bias (trailing column)
        if act:
            acc = _leaky_relu(acc)
        outs.append(acc)
    return outs


def vizae_kernel(x_ref, wb1_ref, wb23_ref, wb4_ref, o_ref):
    # x_ref: (in_f, R, LANES) VMEM block.  wb*_ref: tiny SMEM weight[+bias] tables.
    rows = [x_ref[f].astype(jnp.float32) for f in range(x_ref.shape[0])]

    h = _affine_rows(wb1_ref, rows, act=True)    # enc Linear1 + LeakyReLU (+ Dropout = id, eval)
    d = _affine_rows(wb23_ref, h, act=True)      # folded (enc Linear2 ∘ dec Linear1) + LeakyReLU
    out = _affine_rows(wb4_ref, d, act=False)    # dec Linear2

    # Per-feature dense stores (no concatenate/relayout).
    for f, v in enumerate(out):
        o_ref[f] = v.astype(o_ref.dtype)


def init_params(key, input_size=3, hidden_size=2, output_size=3):
    """Deterministic params, torch-Linear style: W (out, in), b (out,), U(-1/sqrt(fan_in), ...)."""
    def linear(k, fin, fout):
        kw, kb = jax.random.split(k)
        bound = 1.0 / np.sqrt(fin)
        w = jax.random.uniform(kw, (fout, fin), jnp.float32, -bound, bound)
        b = jax.random.uniform(kb, (fout,), jnp.float32, -bound, bound)
        return w, b

    k1, k2, k3, k4 = jax.random.split(key, 4)
    w1, b1 = linear(k1, input_size, hidden_size)
    w2, b2 = linear(k2, hidden_size, hidden_size)
    w3, b3 = linear(k3, hidden_size, output_size)
    w4, b4 = linear(k4, output_size, output_size)
    return (w1, b1, w2, b2, w3, b3, w4, b4)


def _pack_params(params):
    """Fold the two back-to-back linears (exact) and append bias as a trailing column."""
    w1, b1, w2, b2, w3, b3, w4, b4 = params        # torch layout: W (out, in), b (out,)
    w23 = w3 @ w2                                   # (out_f, hidden)
    b23 = w3 @ b2 + b3                              # (out_f,)
    wb1 = jnp.concatenate([w1, b1[:, None]], axis=1).astype(jnp.float32)
    wb23 = jnp.concatenate([w23, b23[:, None]], axis=1).astype(jnp.float32)
    wb4 = jnp.concatenate([w4, b4[:, None]], axis=1).astype(jnp.float32)
    return wb1, wb23, wb4, w4.shape[0]


def vizae_forward_t(x_t, params, *, tile_rows=512):
    """Transpose-free entry point.

    x_t: (input_size, N) float32 (features, batch)  ->  (output_size, N) float32.
    Use this if the surrounding pipeline can keep the (features, batch) layout end-to-end;
    it avoids both wrapper transpose passes over HBM.
    """
    wb1, wb23, wb4, out_f = _pack_params(params)
    in_f, N = x_t.shape

    # Pad batch only to the 8*LANES block granule (not to a full tile), then view as
    # (in_f, n_rows, LANES) via a free row-major reshape -> sublane-dense per-feature slabs.
    granule = 8 * LANES
    n_pad = _round_up(max(N, 1), granule)
    n_rows = n_pad // LANES
    x_p = jnp.pad(x_t.astype(jnp.float32), ((0, 0), (0, n_pad - N)))   # fused pad (single op)
    x_p = x_p.reshape(in_f, n_rows, LANES)

    # Rows per grid step: multiple of 8, capped by what's available.  Default 512 rows
    # (= 65,536 batch elements, ~1.5 MiB HBM traffic per step; ~3 MiB double-buffered VMEM,
    # safe under v5e's 16 MiB scoped default).  Sweep 128-2048 per generation.
    r = max(8, (min(tile_rows, n_rows) // 8) * 8)
    grid = pl.cdiv(n_rows, r)   # last tile may be partial; Pallas masks the boundary

    smem_spec = pl.BlockSpec(memory_space=pltpu.MemorySpace.SMEM)
    out_p = pl.pallas_call(
        vizae_kernel,
        out_shape=jax.ShapeDtypeStruct((out_f, n_rows, LANES), jnp.float32),
        grid=(grid,),
        in_specs=[
            pl.BlockSpec((in_f, r, LANES), lambda i: (0, i, 0)),
            smem_spec, smem_spec, smem_spec,
        ],
        out_specs=pl.BlockSpec((out_f, r, LANES), lambda i: (0, i, 0)),
        compiler_params=pltpu.CompilerParams(
            dimension_semantics=("parallel",),          # v7x: shard steps across both TCs
            vmem_limit_bytes=32 * 1024 * 1024,          # explicit; safe on v5e/v6e/v7x
        ),
    )(x_p, wb1, wb23, wb4)

    # Note: padded batch columns carry bias/LeakyReLU-propagated junk; slice them off.
    return out_p.reshape(out_f, n_pad)[:, :N]


def vizae_forward(x, params, *, tile_rows=512):
    """x: (N, input_size) float32 -> (N, output_size) float32 (torch-compatible layout)."""
    out_t = vizae_forward_t(x.T, params, tile_rows=tile_rows)
    return out_t.T


def vizae_reference(x, params):
    """Pure-JAX reference (unfolded), torch-Linear semantics, eval-mode dropout."""
    w1, b1, w2, b2, w3, b3, w4, b4 = params
    h = _leaky_relu(x @ w1.T + b1)
    z = h @ w2.T + b2
    d = _leaky_relu(z @ w3.T + b3)
    return d @ w4.T + b4


if __name__ == "__main__":
    key = jax.random.PRNGKey(0)
    k_param, k_x = jax.random.split(key)

    input_size, hidden_size, output_size = 3, 2, 3
    batch = 16

    params = init_params(k_param, input_size, hidden_size, output_size)
    x = jax.random.normal(k_x, (batch, input_size), jnp.float32)

    out = jax.jit(vizae_forward)(x, params)
    out = jax.block_until_ready(out)

    ref = vizae_reference(x, params)
    np.testing.assert_allclose(np.asarray(out), np.asarray(ref), rtol=1e-5, atol=1e-5)

    print("KERNEL_OK")
</pallas_src>

<mosaic_0001>
module attributes {stable_mosaic.version = 11 : i64} {
  func.func @vizae_kernel(%arg0: i32, %arg1: memref<3x8x128xf32, #tpu.memory_space<vmem>>, %arg2: memref<2x4xf32, #tpu.memory_space<smem>>, %arg3: memref<3x3xf32, #tpu.memory_space<smem>>, %arg4: memref<3x4xf32, #tpu.memory_space<smem>>, %arg5: memref<3x8x128xf32, #tpu.memory_space<vmem>>) attributes {dimension_semantics = [#tpu.dimension_semantics<parallel>], iteration_bounds = array<i64: 1>, scalar_prefetch = 0 : i64, scratch_operands = 0 : i64, tpu.core_type = #tpu.core_type<tc>, window_params = [{transform_indices = @transform_0, window_bounds = array<i64: 3, 8, 128>}, {transform_indices = @transform_1, window_bounds = array<i64: 2, 4>}, {transform_indices = @transform_2, window_bounds = array<i64: 3, 3>}, {transform_indices = @transform_3, window_bounds = array<i64: 3, 4>}, {transform_indices = @transform_4, window_bounds = array<i64: 3, 8, 128>}]} {
    %c0 = arith.constant 0 : index
    %c0_0 = arith.constant 0 : index
    %c0_1 = arith.constant 0 : index
    %0 = vector.load %arg1[%c0, %c0_0, %c0_1] : memref<3x8x128xf32, #tpu.memory_space<vmem>>, vector<1x8x128xf32>
    %1 = vector.shape_cast %0 : vector<1x8x128xf32> to vector<8x128xf32>
    %c1 = arith.constant 1 : index
    %c0_2 = arith.constant 0 : index
    %c0_3 = arith.constant 0 : index
    %2 = vector.load %arg1[%c1, %c0_2, %c0_3] : memref<3x8x128xf32, #tpu.memory_space<vmem>>, vector<1x8x128xf32>
    %3 = vector.shape_cast %2 : vector<1x8x128xf32> to vector<8x128xf32>
    %c2 = arith.constant 2 : index
    %c0_4 = arith.constant 0 : index
    %c0_5 = arith.constant 0 : index
    %4 = vector.load %arg1[%c2, %c0_4, %c0_5] : memref<3x8x128xf32, #tpu.memory_space<vmem>>, vector<1x8x128xf32>
    %5 = vector.shape_cast %4 : vector<1x8x128xf32> to vector<8x128xf32>
    %c0_6 = arith.constant 0 : index
    %c0_7 = arith.constant 0 : index
    %6 = memref.load %arg2[%c0_6, %c0_7] : memref<2x4xf32, #tpu.memory_space<smem>>
    %7 = vector.broadcast %6 : f32 to vector<8x128xf32>
    %8 = arith.mulf %1, %7 : vector<8x128xf32>
    %c0_8 = arith.constant 0 : index
    %c1_9 = arith.constant 1 : index
    %9 = memref.load %arg2[%c0_8, %c1_9] : memref<2x4xf32, #tpu.memory_space<smem>>
    %10 = vector.broadcast %9 : f32 to vector<8x128xf32>
    %11 = arith.mulf %3, %10 : vector<8x128xf32>
    %12 = arith.addf %8, %11 : vector<8x128xf32>
    %c0_10 = arith.constant 0 : index
    %c2_11 = arith.constant 2 : index
    %13 = memref.load %arg2[%c0_10, %c2_11] : memref<2x4xf32, #tpu.memory_space<smem>>
    %14 = vector.broadcast %13 : f32 to vector<8x128xf32>
    %15 = arith.mulf %5, %14 : vector<8x128xf32>
    %16 = arith.addf %12, %15 : vector<8x128xf32>
    %c0_12 = arith.constant 0 : index
    %c3 = arith.constant 3 : index
    %17 = memref.load %arg2[%c0_12, %c3] : memref<2x4xf32, #tpu.memory_space<smem>>
    %18 = vector.broadcast %17 : f32 to vector<8x128xf32>
    %19 = arith.addf %16, %18 : vector<8x128xf32>
    %cst = arith.constant 0.00999999977 : f32
    %20 = vector.broadcast %cst : f32 to vector<8x128xf32>
    %21 = arith.mulf %20, %19 : vector<8x128xf32>
    %22 = arith.maximumf %19, %21 : vector<8x128xf32>
    %c1_13 = arith.constant 1 : index
    %c0_14 = arith.constant 0 : index
    %23 = memref.load %arg2[%c1_13, %c0_14] : memref<2x4xf32, #tpu.memory_space<smem>>
    %24 = vector.broadcast %23 : f32 to vector<8x128xf32>
    %25 = arith.mulf %1, %24 : vector<8x128xf32>
    %c1_15 = arith.constant 1 : index
    %c1_16 = arith.constant 1 : index
    %26 = memref.load %arg2[%c1_15, %c1_16] : memref<2x4xf32, #tpu.memory_space<smem>>
    %27 = vector.broadcast %26 : f32 to vector<8x128xf32>
    %28 = arith.mulf %3, %27 : vector<8x128xf32>
    %29 = arith.addf %25, %28 : vector<8x128xf32>
    %c1_17 = arith.constant 1 : index
    %c2_18 = arith.constant 2 : index
    %30 = memref.load %arg2[%c1_17, %c2_18] : memref<2x4xf32, #tpu.memory_space<smem>>
    %31 = vector.broadcast %30 : f32 to vector<8x128xf32>
    %32 = arith.mulf %5, %31 : vector<8x128xf32>
    %33 = arith.addf %29, %32 : vector<8x128xf32>
    %c1_19 = arith.constant 1 : index
    %c3_20 = arith.constant 3 : index
    %34 = memref.load %arg2[%c1_19, %c3_20] : memref<2x4xf32, #tpu.memory_space<smem>>
    %35 = vector.broadcast %34 : f32 to vector<8x128xf32>
    %36 = arith.addf %33, %35 : vector<8x128xf32>
    %cst_21 = arith.constant 0.00999999977 : f32
    %37 = vector.broadcast %cst_21 : f32 to vector<8x128xf32>
    %38 = arith.mulf %37, %36 : vector<8x128xf32>
    %39 = arith.maximumf %36, %38 : vector<8x128xf32>
    %c0_22 = arith.constant 0 : index
    %c0_23 = arith.constant 0 : index
    %40 = memref.load %arg3[%c0_22, %c0_23] : memref<3x3xf32, #tpu.memory_space<smem>>
    %41 = vector.broadcast %40 : f32 to vector<8x128xf32>
    %42 = arith.mulf %22, %41 : vector<8x128xf32>
    %c0_24 = arith.constant 0 : index
    %c1_25 = arith.constant 1 : index
    %43 = memref.load %arg3[%c0_24, %c1_25] : memref<3x3xf32, #tpu.memory_space<smem>>
    %44 = vector.broadcast %43 : f32 to vector<8x128xf32>
    %45 = arith.mulf %39, %44 : vector<8x128xf32>
    %46 = arith.addf %42, %45 : vector<8x128xf32>
    %c0_26 = arith.constant 0 : index
    %c2_27 = arith.constant 2 : index
    %47 = memref.load %arg3[%c0_26, %c2_27] : memref<3x3xf32, #tpu.memory_space<smem>>
    %48 = vector.broadcast %47 : f32 to vector<8x128xf32>
    %49 = arith.addf %46, %48 : vector<8x128xf32>
    %cst_28 = arith.constant 0.00999999977 : f32
    %50 = vector.broadcast %cst_28 : f32 to vector<8x128xf32>
    %51 = arith.mulf %50, %49 : vector<8x128xf32>
    %52 = arith.maximumf %49, %51 : vector<8x128xf32>
    %c1_29 = arith.constant 1 : index
    %c0_30 = arith.constant 0 : index
    %53 = memref.load %arg3[%c1_29, %c0_30] : memref<3x3xf32, #tpu.memory_space<smem>>
    %54 = vector.broadcast %53 : f32 to vector<8x128xf32>
    %55 = arith.mulf %22, %54 : vector<8x128xf32>
    %c1_31 = arith.constant 1 : index
    %c1_32 = arith.constant 1 : index
    %56 = memref.load %arg3[%c1_31, %c1_32] : memref<3x3xf32, #tpu.memory_space<smem>>
    %57 = vector.broadcast %56 : f32 to vector<8x128xf32>
    %58 = arith.mulf %39, %57 : vector<8x128xf32>
    %59 = arith.addf %55, %58 : vector<8x128xf32>
    %c1_33 = arith.constant 1 : index
    %c2_34 = arith.constant 2 : index
    %60 = memref.load %arg3[%c1_33, %c2_34] : memref<3x3xf32, #tpu.memory_space<smem>>
    %61 = vector.broadcast %60 : f32 to vector<8x128xf32>
    %62 = arith.addf %59, %61 : vector<8x128xf32>
    %cst_35 = arith.constant 0.00999999977 : f32
    %63 = vector.broadcast %cst_35 : f32 to vector<8x128xf32>
    %64 = arith.mulf %63, %62 : vector<8x128xf32>
    %65 = arith.maximumf %62, %64 : vector<8x128xf32>
    %c2_36 = arith.constant 2 : index
    %c0_37 = arith.constant 0 : index
    %66 = memref.load %arg3[%c2_36, %c0_37] : memref<3x3xf32, #tpu.memory_space<smem>>
    %67 = vector.broadcast %66 : f32 to vector<8x128xf32>
    %68 = arith.mulf %22, %67 : vector<8x128xf32>
    %c2_38 = arith.constant 2 : index
    %c1_39 = arith.constant 1 : index
    %69 = memref.load %arg3[%c2_38, %c1_39] : memref<3x3xf32, #tpu.memory_space<smem>>
    %70 = vector.broadcast %69 : f32 to vector<8x128xf32>
    %71 = arith.mulf %39, %70 : vector<8x128xf32>
    %72 = arith.addf %68, %71 : vector<8x128xf32>
    %c2_40 = arith.constant 2 : index
    %c2_41 = arith.constant 2 : index
    %73 = memref.load %arg3[%c2_40, %c2_41] : memref<3x3xf32, #tpu.memory_space<smem>>
    %74 = vector.broadcast %73 : f32 to vector<8x128xf32>
    %75 = arith.addf %72, %74 : vector<8x128xf32>
    %cst_42 = arith.constant 0.00999999977 : f32
    %76 = vector.broadcast %cst_42 : f32 to vector<8x128xf32>
    %77 = arith.mulf %76, %75 : vector<8x128xf32>
    %78 = arith.maximumf %75, %77 : vector<8x128xf32>
    %c0_43 = arith.constant 0 : index
    %c0_44 = arith.constant 0 : index
    %79 = memref.load %arg4[%c0_43, %c0_44] : memref<3x4xf32, #tpu.memory_space<smem>>
    %80 = vector.broadcast %79 : f32 to vector<8x128xf32>
    %81 = arith.mulf %52, %80 : vector<8x128xf32>
    %c0_45 = arith.constant 0 : index
    %c1_46 = arith.constant 1 : index
    %82 = memref.load %arg4[%c0_45, %c1_46] : memref<3x4xf32, #tpu.memory_space<smem>>
    %83 = vector.broadcast %82 : f32 to vector<8x128xf32>
    %84 = arith.mulf %65, %83 : vector<8x128xf32>
    %85 = arith.addf %81, %84 : vector<8x128xf32>
    %c0_47 = arith.constant 0 : index
    %c2_48 = arith.constant 2 : index
    %86 = memref.load %arg4[%c0_47, %c2_48] : memref<3x4xf32, #tpu.memory_space<smem>>
    %87 = vector.broadcast %86 : f32 to vector<8x128xf32>
    %88 = arith.mulf %78, %87 : vector<8x128xf32>
    %89 = arith.addf %85, %88 : vector<8x128xf32>
    %c0_49 = arith.constant 0 : index
    %c3_50 = arith.constant 3 : index
    %90 = memref.load %arg4[%c0_49, %c3_50] : memref<3x4xf32, #tpu.memory_space<smem>>
    %91 = vector.broadcast %90 : f32 to vector<8x128xf32>
    %92 = arith.addf %89, %91 : vector<8x128xf32>
    %c1_51 = arith.constant 1 : index
    %c0_52 = arith.constant 0 : index
    %93 = memref.load %arg4[%c1_51, %c0_52] : memref<3x4xf32, #tpu.memory_space<smem>>
    %94 = vector.broadcast %93 : f32 to vector<8x128xf32>
    %95 = arith.mulf %52, %94 : vector<8x128xf32>
    %c1_53 = arith.constant 1 : index
    %c1_54 = arith.constant 1 : index
    %96 = memref.load %arg4[%c1_53, %c1_54] : memref<3x4xf32, #tpu.memory_space<smem>>
    %97 = vector.broadcast %96 : f32 to vector<8x128xf32>
    %98 = arith.mulf %65, %97 : vector<8x128xf32>
    %99 = arith.addf %95, %98 : vector<8x128xf32>
    %c1_55 = arith.constant 1 : index
    %c2_56 = arith.constant 2 : index
    %100 = memref.load %arg4[%c1_55, %c2_56] : memref<3x4xf32, #tpu.memory_space<smem>>
    %101 = vector.broadcast %100 : f32 to vector<8x128xf32>
    %102 = arith.mulf %78, %101 : vector<8x128xf32>
    %103 = arith.addf %99, %102 : vector<8x128xf32>
    %c1_57 = arith.constant 1 : index
    %c3_58 = arith.constant 3 : index
    %104 = memref.load %arg4[%c1_57, %c3_58] : memref<3x4xf32, #tpu.memory_space<smem>>
    %105 = vector.broadcast %104 : f32 to vector<8x128xf32>
    %106 = arith.addf %103, %105 : vector<8x128xf32>
    %c2_59 = arith.constant 2 : index
    %c0_60 = arith.constant 0 : index
    %107 = memref.load %arg4[%c2_59, %c0_60] : memref<3x4xf32, #tpu.memory_space<smem>>
    %108 = vector.broadcast %107 : f32 to vector<8x128xf32>
    %109 = arith.mulf %52, %108 : vector<8x128xf32>
    %c2_61 = arith.constant 2 : index
    %c1_62 = arith.constant 1 : index
    %110 = memref.load %arg4[%c2_61, %c1_62] : memref<3x4xf32, #tpu.memory_space<smem>>
    %111 = vector.broadcast %110 : f32 to vector<8x128xf32>
    %112 = arith.mulf %65, %111 : vector<8x128xf32>
    %113 = arith.addf %109, %112 : vector<8x128xf32>
    %c2_63 = arith.constant 2 : index
    %c2_64 = arith.constant 2 : index
    %114 = memref.load %arg4[%c2_63, %c2_64] : memref<3x4xf32, #tpu.memory_space<smem>>
    %115 = vector.broadcast %114 : f32 to vector<8x128xf32>
    %116 = arith.mulf %78, %115 : vector<8x128xf32>
    %117 = arith.addf %113, %116 : vector<8x128xf32>
    %c2_65 = arith.constant 2 : index
    %c3_66 = arith.constant 3 : index
    %118 = memref.load %arg4[%c2_65, %c3_66] : memref<3x4xf32, #tpu.memory_space<smem>>
    %119 = vector.broadcast %118 : f32 to vector<8x128xf32>
    %120 = arith.addf %117, %119 : vector<8x128xf32>
    %c0_67 = arith.constant 0 : index
    %c0_68 = arith.constant 0 : index
    %c0_69 = arith.constant 0 : index
    %121 = vector.load %arg5[%c0_67, %c0_68, %c0_69] : memref<3x8x128xf32, #tpu.memory_space<vmem>>, vector<1x8x128xf32>
    %122 = vector.shape_cast %121 : vector<1x8x128xf32> to vector<8x128xf32>
    %123 = vector.shape_cast %92 : vector<8x128xf32> to vector<1x8x128xf32>
    tpu.vector_store %arg5[%c0_67, %c0_68, %c0_69], %123 {strides = array<i32>} : memref<3x8x128xf32, #tpu.memory_space<vmem>>, vector<1x8x128xf32>,
    %c1_70 = arith.constant 1 : index
    %c0_71 = arith.constant 0 : index
    %c0_72 = arith.constant 0 : index
    %124 = vector.load %arg5[%c1_70, %c0_71, %c0_72] : memref<3x8x128xf32, #tpu.memory_space<vmem>>, vector<1x8x128xf32>
    %125 = vector.shape_cast %124 : vector<1x8x128xf32> to vector<8x128xf32>
    %126 = vector.shape_cast %106 : vector<8x128xf32> to vector<1x8x128xf32>
    tpu.vector_store %arg5[%c1_70, %c0_71, %c0_72], %126 {strides = array<i32>} : memref<3x8x128xf32, #tpu.memory_space<vmem>>, vector<1x8x128xf32>,
    %c2_73 = arith.constant 2 : index
    %c0_74 = arith.constant 0 : index
    %c0_75 = arith.constant 0 : index
    %127 = vector.load %arg5[%c2_73, %c0_74, %c0_75] : memref<3x8x128xf32, #tpu.memory_space<vmem>>, vector<1x8x128xf32>
    %128 = vector.shape_cast %127 : vector<1x8x128xf32> to vector<8x128xf32>
    %129 = vector.shape_cast %120 : vector<8x128xf32> to vector<1x8x128xf32>
    tpu.vector_store %arg5[%c2_73, %c0_74, %c0_75], %129 {strides = array<i32>} : memref<3x8x128xf32, #tpu.memory_space<vmem>>, vector<1x8x128xf32>,
    return
  }
  func.func @transform_0(%arg0: i32) -> (i32, i32, i32) {
    %c0_i32 = arith.constant 0 : i32
    %c0_i32_0 = arith.constant 0 : i32
    %c0_i32_1 = arith.constant 0 : i32
    return %c0_i32, %arg0, %c0_i32_0 : i32, i32, i32
  }
  func.func @transform_1(%arg0: i32) -> (i32, i32) {
    %c0_i32 = arith.constant 0 : i32
    %c0_i32_0 = arith.constant 0 : i32
    %c0_i32_1 = arith.constant 0 : i32
    return %c0_i32, %c0_i32_0 : i32, i32
  }
  func.func @transform_2(%arg0: i32) -> (i32, i32) {
    %c0_i32 = arith.constant 0 : i32
    %c0_i32_0 = arith.constant 0 : i32
    %c0_i32_1 = arith.constant 0 : i32
    return %c0_i32, %c0_i32_0 : i32, i32
  }
  func.func @transform_3(%arg0: i32) -> (i32, i32) {
    %c0_i32 = arith.constant 0 : i32
    %c0_i32_0 = arith.constant 0 : i32
    %c0_i32_1 = arith.constant 0 : i32
    return %c0_i32, %c0_i32_0 : i32, i32
  }
  func.func @transform_4(%arg0: i32) -> (i32, i32, i32) {
    %c0_i32 = arith.constant 0 : i32
    %c0_i32_0 = arith.constant 0 : i32
    %c0_i32_1 = arith.constant 0 : i32
    return %c0_i32, %arg0, %c0_i32_0 : i32, i32, i32
  }
}

</mosaic_0001>

<bundles_post_ra>
// kernel: vizae_forward.1
= control target key start
LH: loop header
LB: loop body
LE: loop exit
PB: predicated region body
PF: predicated region fallthrough
CT: control target
= control target key end

     0   :  { %9 = vsyncpa [#allocation3], 0  ;;  %s373_s0 = inlined_call_operand.vmem [shape: f32[3,8,128], index: 0, kind: input, shape index: {}]   ;;  %s374_s1 = inlined_call_operand.vmem [shape: f32[2,4], index: 1, kind: input, shape index: {}]   ;;  %s375_s2 = inlined_call_operand.vmem [shape: f32[3,3], index: 2, kind: input, shape index: {}]   ;;  %s376_s3 = inlined_call_operand.vmem [shape: f32[3,4], index: 3, kind: input, shape index: {}]   ;;  %s377_s4 = inlined_call_operand.vmem [shape: f32[3,8,128], index: 4, kind: output, shape index: {}]  }
   0x1   :  { %10 = vsyncpa [#allocation5], 0  ;;  %s29_s17 = sshll.u32 %s375_s2, 4  ;;  %s19_s20 = sshll.u32 %s374_s1, 4  ;;  %s30_s17 = int_to_ptr.vmem [resolvable:$true] %s29_s17  ;;  %s20_s20 = int_to_ptr.vmem [resolvable:$true] %s19_s20 }
   0x2   :  { %s212_s21 = scalar_lea.vmem %s30_s17, 64  ;;  %p217_p1 = scmp.lt.s32.totalorder %s30_s17, %s30_s17 }
   0x3   :  { %p213_p0 = scmp.ne.s32.totalorder %s30_s17, %s212_s21  ;;  %p218_p2 = scmp.lt.s32.totalorder %s212_s21, %s212_s21 }
   0x5   :  { %p219_p3 = por %p218_p2, %p217_p1 }
   0x7   :  { %p220_p4 = pnand %p219_p3, %p213_p0 }
   0x9   :  { %223 = shalt.err (!%p220_p4)
}
   0xa   :  { %s252_s22 = smov [#allocation4]   ;;  %s224_s23 = scalar_lea.vmem %s20_s20, 32 }
   0xb   :  { %32 = dma.vmem_to_smem %s30_s17, 64, %s252_s22, [#allocation5]  }
   0xc   :  { %p225_p5 = scmp.ne.s32.totalorder %s20_s20, %s224_s23  ;;  %p229_p6 = scmp.lt.s32.totalorder %s20_s20, %s20_s20 }
   0xd   :  { %p230_p7 = scmp.lt.s32.totalorder %s224_s23, %s224_s23 }
   0xf   :  { %p231_p8 = por %p230_p7, %p229_p6 }
  0x11   :  { %p232_p9 = pnand %p231_p8, %p225_p5 }
  0x13   :  { %235 = shalt.err (!%p232_p9)
}
  0x14   :  { %s253_s2 = smov [#allocation2]   ;;  %s39_s25 = sshll.u32 %s376_s3, 4  ;;  %s40_s25 = int_to_ptr.vmem [resolvable:$true] %s39_s25 }
  0x15   :  { %22 = dma.vmem_to_smem %s20_s20, 32, %s253_s2, [#allocation3]  }
  0x16   :  { %s236_s26 = scalar_lea.vmem %s40_s25, 64  ;;  %p241_p11 = scmp.lt.s32.totalorder %s40_s25, %s40_s25 }
  0x17   :  { %p237_p10 = scmp.ne.s32.totalorder %s40_s25, %s236_s26  ;;  %p242_p12 = scmp.lt.s32.totalorder %s236_s26, %s236_s26 }
  0x19   :  { %p243_p13 = por %p242_p12, %p241_p11 }
  0x1b   :  { %p244_p0 = pnand %p243_p13, %p237_p10 }
  0x1d   :  { %247 = shalt.err (!%p244_p0)
}
  0x1e   :  { %s254_s27 = smov [#allocation6]  }
  0x1f   :  { %42 = dma.vmem_to_smem %s40_s25, 64, %s254_s27, [#allocation5]  }
  0x20   :  { %248 = dma.done.wait [#allocation3], 32  }
  0x21   :  { %249 = vsyncadd [#allocation3], 4294967264 }
  0x22   :  { %250 = dma.done.wait [#allocation5], 128  }
  0x23   :  { %251 = vsyncadd [#allocation5], 4294967168 }
  0x24   :  { %52 = sfence }
  0x25   :  { %s58_s28 = sld [smem:[#allocation2]]  ;;  %s181_s29 = sld [smem:[#allocation2 + $0x1]]  ;;  %v53_v0 = vld [vmem:[%s373_s0] sm:$0xff]  ;;  %v179_v1 = vld [vmem:[%s373_s0 + $0x8] sm:$0xff]  ;;  %v180_v2 = vld [vmem:[%s373_s0 + $0x10] sm:$0xff] }
  0x26   :  { %s182_s30 = sld [smem:[#allocation2 + $0x2]]  ;;  %s289_s5 = sld [smem:[#allocation2 + $0x3]] }
  0x27   :  { %s184_s3 = sld [smem:[#allocation2 + $0x80]]  ;;  %s185_s6 = sld [smem:[#allocation2 + $0x81]] }
  0x28   :  { %s186_s7 = sld [smem:[#allocation2 + $0x82]]  ;;  %s187_s14 = sld [smem:[#allocation2 + $0x83]] }
  0x29   :  { %s300_s15 = sld [smem:[#allocation4]]  ;;  %s306_s0 = sld [smem:[#allocation4 + $0x1]] }
  0x2a   :  { %s302_s16 = sld [smem:[#allocation4 + $0x80]]  ;;  %s309_s18 = sld [smem:[#allocation4 + $0x81]] }
  0x2b   :  { %v59_v3 = vstv %s58_s28  ;;  %v62_v5 = vstv %s181_s29  ;;  %s304_s17 = sld [smem:[#allocation4 + $0x100]]  ;;  %s311_s19 = sld [smem:[#allocation4 + $0x101]] }
  0x2c   :  { %v60_v4 = vmul.f32 %v59_v3, %v53_v0  ;;  %v66_v6 = vstv %s182_s30  ;;  %v63_v7 = vmul.f32 %v179_v1, %v62_v5  ;;  %v70_v16 = vstv %s289_s5  ;;  %s313_s20 = sld [smem:[#allocation4 + $0x2]]  ;;  %s322_s23 = sld [smem:[#allocation6]] }
  0x2d   :  { %v67_v8 = vmul.f32 %v180_v2, %v66_v6  ;;  %v75_v9 = vstv %s184_s3  ;;  %v78_v11 = vstv %s185_s6  ;;  %s315_s21 = sld [smem:[#allocation4 + $0x82]]  ;;  %s327_s2 = sld [smem:[#allocation6 + $0x1]] }
  0x2e   :  { %v76_v10 = vmul.f32 %v75_v9, %v53_v0  ;;  %v82_v12 = vstv %s186_s7  ;;  %v64_v13 = vadd.f32 %v63_v7, %v60_v4  ;;  %v79_v14 = vmul.f32 %v179_v1, %v78_v11  ;;  %s317_s22 = sld [smem:[#allocation4 + $0x102]]  ;;  %s331_s24 = sld [smem:[#allocation6 + $0x80]] }
  0x2f   :  { %v83_v15 = vmul.f32 %v180_v2, %v82_v12  ;;  %v86_v19 = vstv %s187_s14  ;;  %v91_v24 = vstv %s300_s15  ;;  %v94_v29 = vstv %s306_s0  ;;  %s329_s1 = sld [smem:[#allocation6 + $0x2]]  ;;  %s333_s25 = sld [smem:[#allocation6 + $0x81]] }
  0x30   :  { %v68_v17 = vadd.f32 %v67_v8, %v64_v13  ;;  %v80_v18 = vadd.f32 %v79_v14, %v76_v10  ;;  %v103_v25 = vstv %s302_s16  ;;  %v106_v30 = vstv %s309_s18  ;;  %s335_s26 = sld [smem:[#allocation6 + $0x82]]  ;;  %s337_s27 = sld [smem:[#allocation6 + $0x100]] }
  0x31   :  { %v115_v26 = vstv %s304_s17  ;;  %v118_v31 = vstv %s311_s19  ;;  %s339_s28 = sld [smem:[#allocation6 + $0x101]]  ;;  %s344_s29 = sld [smem:[#allocation6 + $0x102]] }
  0x32   :  { %v71_v20 = vadd.f32 %v70_v16, %v68_v17  ;;  %v84_v21 = vadd.f32 %v83_v15, %v80_v18  ;;  %v98_v39 = vstv %s313_s20  ;;  %s346_s30 = sld [smem:[#allocation6 + $0x3]]  ;;  %v127_v48 = vstv %s322_s23 }
  0x33   :  { %v110_v40 = vstv %s315_s21  ;;  %v130_v49 = vstv %s327_s2  ;;  %s350_s5 = sld [smem:[#allocation6 + $0x83]] }
  0x34   :  { %v72_v22 = vmul.f32 0.01, %v71_v20  ;;  %v87_v23 = vadd.f32 %v86_v19, %v84_v21  ;;  %v122_v41 = vstv %s317_s22  ;;  %s352_s3 = sld [smem:[#allocation6 + $0x103]]  ;;  %v141_v54 = vstv %s331_s24 }
  0x35   :  { %v134_v53 = vstv %s329_s1  ;;  %v144_v55 = vstv %s333_s25 }
  0x36   :  { %v73_v27 = vmax.f32 %v71_v20, %v72_v22  ;;  %v88_v28 = vmul.f32 0.01, %v87_v23  ;;  %v148_v56 = vstv %s335_s26  ;;  %v155_v57 = vstv %s337_s27 }
  0x37   :  { %v158_v61 = vstv %s339_s28  ;;  %v162_v62 = vstv %s344_s29 }
  0x38   :  { %v89_v32 = vmax.f32 %v87_v23, %v88_v28  ;;  %v92_v33 = vmul.f32 %v91_v24, %v73_v27  ;;  %v104_v34 = vmul.f32 %v103_v25, %v73_v27  ;;  %v116_v35 = vmul.f32 %v115_v26, %v73_v27 }
  0x39   :  { %v138_v9 = vstv %s346_s30  ;;  %v152_v13 = vstv %s350_s5 }
  0x3a   :  { %v95_v36 = vmul.f32 %v94_v29, %v89_v32  ;;  %v107_v37 = vmul.f32 %v106_v30, %v89_v32  ;;  %v119_v38 = vmul.f32 %v118_v31, %v89_v32  ;;  %v166_v14 = vstv %s352_s3 }
  0x3c   :  { %v96_v42 = vadd.f32 %v95_v36, %v92_v33  ;;  %v108_v43 = vadd.f32 %v107_v37, %v104_v34  ;;  %v120_v44 = vadd.f32 %v119_v38, %v116_v35 }
  0x3e   :  { %v99_v45 = vadd.f32 %v98_v39, %v96_v42  ;;  %v111_v46 = vadd.f32 %v110_v40, %v108_v43  ;;  %v123_v47 = vadd.f32 %v122_v41, %v120_v44 }
  0x40   :  { %v100_v50 = vmul.f32 0.01, %v99_v45  ;;  %v112_v51 = vmul.f32 0.01, %v111_v46  ;;  %v124_v52 = vmul.f32 0.01, %v123_v47 }
  0x42   :  { %v101_v58 = vmax.f32 %v99_v45, %v100_v50  ;;  %v113_v59 = vmax.f32 %v111_v46, %v112_v51  ;;  %v125_v60 = vmax.f32 %v123_v47, %v124_v52 }
  0x44   :  { %v128_v63 = vmul.f32 %v127_v48, %v101_v58  ;;  %v131_v0 = vmul.f32 %v130_v49, %v113_v59  ;;  %v135_v1 = vmul.f32 %v134_v53, %v125_v60  ;;  %v142_v2 = vmul.f32 %v141_v54, %v101_v58 }
  0x45   :  { %v145_v3 = vmul.f32 %v144_v55, %v113_v59  ;;  %v149_v4 = vmul.f32 %v148_v56, %v125_v60  ;;  %v156_v5 = vmul.f32 %v155_v57, %v101_v58  ;;  %v159_v6 = vmul.f32 %v158_v61, %v113_v59 }
  0x46   :  { %v132_v7 = vadd.f32 %v131_v0, %v128_v63  ;;  %v163_v8 = vmul.f32 %v162_v62, %v125_v60 }
  0x47   :  { %v146_v10 = vadd.f32 %v145_v3, %v142_v2  ;;  %v160_v11 = vadd.f32 %v159_v6, %v156_v5 }
  0x48   :  { %v136_v12 = vadd.f32 %v135_v1, %v132_v7 }
  0x49   :  { %v150_v15 = vadd.f32 %v149_v4, %v146_v10  ;;  %v164_v16 = vadd.f32 %v163_v8, %v160_v11 }
  0x4a   :  { %v139_v17 = vadd.f32 %v138_v9, %v136_v12 }
  0x4b   :  { %v153_v18 = vadd.f32 %v152_v13, %v150_v15  ;;  %v167_v19 = vadd.f32 %v166_v14, %v164_v16 }
  0x4c   :  { %168 = vst [vmem:[%s377_s4] sm:$0xff] %v139_v17 }
  0x4d   :  { %207 = vst [vmem:[%s377_s4 + $0x8] sm:$0xff] %v153_v18  ;;  %208 = vst [vmem:[%s377_s4 + $0x10] sm:$0xff] %v167_v19 }
  0x4e   :  { %177 = vsyncpa [#allocation3], 1 }
  0x4f   :  { %178 = vsyncpa [#allocation5], 1 }

</bundles_post_ra>
